<compile_context>
chip_gen: v7x
topology: tpu7x:2x2x1
jax: 0.10.0
libtpu: 0.0.40
codegen_flags: <defaults>
</compile_context>

<pallas_src>
import math

import jax
import jax.numpy as jnp
from jax.experimental import pallas as pl
from jax.experimental.pallas import tpu as pltpu


def _bias_kernel(x_ref, b_ref, o_ref):
    # x_ref: (tile_m, tile_n), b_ref: (1, tile_n) -> VPU broadcast add.
    o_ref[...] = x_ref[...] + b_ref[...]


_TILE_BYTES = 4 * 1024 * 1024     # per-tile target; x4 for double-buffered in+out
_VMEM_LIMIT = 32 * 1024 * 1024    # explicit scoped-VMEM budget (safe on v5e/v6e/v7x)
_MAX_ROWS = 4096                  # cap on tile_m


def _sublane(dtype) -> int:
    # native sublane packing: 8 for 4-byte, 16 for 2-byte, 32 for 1-byte dtypes
    return max(8, 32 // jnp.dtype(dtype).itemsize)


def _round_down(x, m):
    return max(m, (x // m) * m)


def bias_forward(x, bias):
    """Forward of Bias: x + bias, where bias matches the trailing dims of x."""
    orig_shape = x.shape
    assert x.shape[x.ndim - bias.ndim:] == bias.shape, \
        "bias must match the trailing dims of x"

    bias = bias.astype(x.dtype)
    D = math.prod(bias.shape) if bias.ndim else 1

    # Flatten: broadcast (leading) dims -> rows, bias dims -> lanes. No copies:
    # these reshapes preserve row-major contiguity.
    x2d = x.reshape(-1, D)
    b1d = bias.reshape(D)
    M = x2d.shape[0]

    # Lane-densify narrow hidden dims: fold rows into lanes so the output last
    # dim is a multiple of 128 (unmasked stores, full vregs).
    if D < 128 and 128 % D == 0:
        k = 128 // D
        if M >= k and M % k == 0:
            x2d = x2d.reshape(M // k, k * D)
            b1d = jnp.tile(b1d, k)
            M, D = M // k, k * D

    b2d = b1d.reshape(1, D)

    itemsize = jnp.dtype(x.dtype).itemsize
    sub = _sublane(x.dtype)
    row_bytes = D * itemsize

    if sub * row_bytes <= _TILE_BYTES:
        # Common case: full-width rows fit easily -> 1-D grid over rows.
        tile_m_cap = min(_MAX_ROWS, _round_down(_TILE_BYTES // row_bytes, sub))
        tile_m = M if M <= tile_m_cap else tile_m_cap  # full dim or sublane-aligned
        grid = (pl.cdiv(M, tile_m),)
        in_specs = [
            pl.BlockSpec((tile_m, D), lambda i: (i, 0)),
            pl.BlockSpec((1, D), lambda i: (0, 0)),
        ]
        out_specs = pl.BlockSpec((tile_m, D), lambda i: (i, 0))
        dim_sem = ("parallel",)
    else:
        # Very wide hidden dim: tile both rows and lanes to bound VMEM.
        tile_n = 2048 if D >= 2048 else _round_down(D, 128)
        tile_m_cap = min(_MAX_ROWS,
                         _round_down(_TILE_BYTES // (tile_n * itemsize), sub))
        tile_m = M if M <= tile_m_cap else tile_m_cap
        grid = (pl.cdiv(M, tile_m), pl.cdiv(D, tile_n))
        in_specs = [
            pl.BlockSpec((tile_m, tile_n), lambda i, j: (i, j)),
            pl.BlockSpec((1, tile_n), lambda i, j: (0, j)),
        ]
        out_specs = pl.BlockSpec((tile_m, tile_n), lambda i, j: (i, j))
        dim_sem = ("parallel", "parallel")

    out = pl.pallas_call(
        _bias_kernel,
        out_shape=jax.ShapeDtypeStruct((M, D), x.dtype),
        grid=grid,
        in_specs=in_specs,
        out_specs=out_specs,
        compiler_params=pltpu.CompilerParams(
            dimension_semantics=dim_sem,
            vmem_limit_bytes=_VMEM_LIMIT,
        ),
    )(x2d, b2d)

    return out.reshape(orig_shape)


if __name__ == "__main__":
    key = jax.random.PRNGKey(0)
    kx, kx2 = jax.random.split(key)

    # Shapes implied by the module: x (batch, seq, hidden), bias (hidden,).
    B, S, H = 2, 8, 32
    x = jax.random.normal(kx, (B, S, H), dtype=jnp.float32)
    # Deterministic nonzero bias so the add is actually exercised.
    bias = (jnp.arange(H, dtype=jnp.float32) - H / 2) * 0.01

    y = jax.block_until_ready(bias_forward(x, bias))
    y_ref = x + bias
    assert y.shape == x.shape
    assert jnp.allclose(y, y_ref, atol=1e-6), "mismatch vs reference (lane-folded path)"

    # Second small case: hidden dim not a divisor of 128 -> no lane folding,
    # full-dim (masked-store) block path.
    H2 = 48
    x2 = jax.random.normal(kx2, (3, 5, H2), dtype=jnp.float32)
    bias2 = (jnp.arange(H2, dtype=jnp.float32) * 0.02) - 0.3
    y2 = jax.block_until_ready(bias_forward(x2, bias2))
    assert jnp.allclose(y2, x2 + bias2, atol=1e-6), "mismatch vs reference (no-fold path)"

    print("KERNEL_OK")
</pallas_src>

<mosaic_0001>
module attributes {stable_mosaic.version = 11 : i64} {
  func.func @_bias_kernel(%arg0: i32, %arg1: memref<4x128xf32, #tpu.memory_space<vmem>>, %arg2: memref<1x128xf32, #tpu.memory_space<vmem>>, %arg3: memref<4x128xf32, #tpu.memory_space<vmem>>) attributes {dimension_semantics = [#tpu.dimension_semantics<parallel>], iteration_bounds = array<i64: 1>, scalar_prefetch = 0 : i64, scratch_operands = 0 : i64, tpu.core_type = #tpu.core_type<tc>, window_params = [{transform_indices = @transform_0, window_bounds = array<i64: 4, 128>}, {pipeline_mode = #tpu.pipeline_mode<synchronous>, transform_indices = @transform_1, window_bounds = array<i64: 1, 128>}, {transform_indices = @transform_2, window_bounds = array<i64: 4, 128>}]} {
    %c0 = arith.constant 0 : index
    %c0_0 = arith.constant 0 : index
    %0 = vector.load %arg1[%c0, %c0_0] : memref<4x128xf32, #tpu.memory_space<vmem>>, vector<4x128xf32>
    %c0_1 = arith.constant 0 : index
    %c0_2 = arith.constant 0 : index
    %1 = vector.load %arg2[%c0_1, %c0_2] : memref<1x128xf32, #tpu.memory_space<vmem>>, vector<1x128xf32>
    %2 = vector.broadcast %1 : vector<1x128xf32> to vector<4x128xf32>
    %3 = arith.addf %0, %2 : vector<4x128xf32>
    %c0_3 = arith.constant 0 : index
    %c0_4 = arith.constant 0 : index
    %4 = vector.load %arg3[%c0_3, %c0_4] : memref<4x128xf32, #tpu.memory_space<vmem>>, vector<4x128xf32>
    tpu.vector_store %arg3[%c0_3, %c0_4], %3 {strides = array<i32>} : memref<4x128xf32, #tpu.memory_space<vmem>>, vector<4x128xf32>,
    return
  }
  func.func @transform_0(%arg0: i32) -> (i32, i32) {
    %c0_i32 = arith.constant 0 : i32
    %c0_i32_0 = arith.constant 0 : i32
    return %arg0, %c0_i32 : i32, i32
  }
  func.func @transform_1(%arg0: i32) -> (i32, i32) {
    %c0_i32 = arith.constant 0 : i32
    %c0_i32_0 = arith.constant 0 : i32
    %c0_i32_1 = arith.constant 0 : i32
    return %c0_i32, %c0_i32_0 : i32, i32
  }
  func.func @transform_2(%arg0: i32) -> (i32, i32) {
    %c0_i32 = arith.constant 0 : i32
    %c0_i32_0 = arith.constant 0 : i32
    return %arg0, %c0_i32 : i32, i32
  }
}

</mosaic_0001>

<bundles_post_ra>
// kernel: tpu_custom_call.1
= control target key start
LH: loop header
LB: loop body
LE: loop exit
PB: predicated region body
PF: predicated region fallthrough
CT: control target
= control target key end

     0   :  { %7 = vsyncpa [#allocation3], 0  ;;  %s144_s0 = inlined_call_operand.hbm [shape: f32[4,128], index: 0, kind: input, shape index: {}]   ;;  %s145_s1 = inlined_call_operand.vmem [shape: f32[1,128], index: 1, kind: input, shape index: {}]   ;;  %s146_s2 = inlined_call_operand.hbm [shape: f32[4,128], index: 2, kind: output, shape index: {}]  }
   0x1   :  { %8 = vsyncpa [#allocation4], 0  ;;  %s100_s9 = smov [#allocation2]   ;;  %s52_s13 = scalar_lea.hbm %s144_s0, 64 }
   0x2   :  { %s15_s10 = sshll.u32 %s100_s9, 4  ;;  %p53_p0 = scmp.ne.s32.totalorder %s144_s0, %s52_s13  ;;  %s16_s10 = int_to_ptr.vmem [resolvable:$true] %s15_s10 }
   0x3   :  { %p56_p1 = scmp.lt.u32.totalorder %s52_s13, %s144_s0 }
   0x5   :  { %p58_p2 = pnand %p56_p1, %p53_p0 }
   0x7   :  { %61 = shalt.err (!%p58_p2)
}
   0x8   :  { %s62_s18 = scalar_lea.vmem %s16_s10, 64  ;;  %p67_p4 = scmp.lt.s32.totalorder %s16_s10, %s16_s10 }
   0x9   :  { %p63_p3 = scmp.ne.s32.totalorder %s16_s10, %s62_s18  ;;  %p68_p5 = scmp.lt.s32.totalorder %s62_s18, %s62_s18 }
   0xb   :  { %p69_p6 = por %p68_p5, %p67_p4 }
   0xd   :  { %p70_p7 = pnand %p69_p6, %p63_p3 }
   0xf   :  { %73 = shalt.err (!%p70_p7)
}
  0x10   :  { %18 = dma.hbm_to_vmem [thread:$0]  %s144_s0, 64, %s16_s10, [#allocation3]  }
  0x11   :  { %96 = dma.done.wait [#allocation3], 64  }
  0x12   :  { %97 = vsyncadd [#allocation3], 4294967232  ;;  %s101_s21 = smov [#allocation5]   ;;  %v24_v0 = vld [vmem:[#allocation2] sm:$0xf] }
  0x13   :  { %s40_s22 = sshll.u32 %s101_s21, 4  ;;  %v49_v1 = vld [vmem:[%s145_s1] ss:$0 sm:$0xff]  ;;  %s41_s22 = int_to_ptr.vmem [resolvable:$true] %s40_s22 }
  0x14   :  { %v32_v2 = vadd.f32 %v49_v1, %v24_v0  ;;  %s74_s25 = scalar_lea.vmem %s41_s22, 64  ;;  %p79_p9 = scmp.lt.s32.totalorder %s41_s22, %s41_s22 }
  0x15   :  { %p75_p8 = scmp.ne.s32.totalorder %s41_s22, %s74_s25  ;;  %p80_p10 = scmp.lt.s32.totalorder %s74_s25, %s74_s25 }
  0x16   :  { %33 = vst [vmem:[#allocation5] sm:$0xf] %v32_v2 }
  0x17   :  { %p81_p11 = por %p80_p10, %p79_p9 }
  0x19   :  { %p82_p12 = pnand %p81_p11, %p75_p8 }
  0x1b   :  { %85 = shalt.err (!%p82_p12)
}
  0x1c   :  { %s86_s27 = scalar_lea.hbm %s146_s2, 64 }
  0x1d   :  { %p87_p13 = scmp.ne.s32.totalorder %s146_s2, %s86_s27  ;;  %p90_p0 = scmp.lt.u32.totalorder %s86_s27, %s146_s2 }
  0x1f   :  { %p92_p1 = pnand %p90_p0, %p87_p13 }
  0x21   :  { %95 = shalt.err (!%p92_p1)
}
  0x22   :  { %43 = dma.vmem_to_hbm [thread:$0]  %s41_s22, 64, %s146_s2, [#allocation4]  }
  0x23   :  { %98 = dma.done.wait [#allocation4], 64  }
  0x24   :  { %99 = vsyncadd [#allocation4], 4294967232 }
  0x25   :  { %47 = vsyncpa [#allocation3], 1 }
  0x26   :  { %48 = vsyncpa [#allocation4], 1 }

</bundles_post_ra>
